<compile_context>
chip_gen: v7x
topology: tpu7x:2x2x1
jax: 0.10.0
libtpu: 0.0.40
codegen_flags: <defaults>
</compile_context>

<pallas_src>
import jax
import jax.numpy as jnp
from jax.experimental import pallas as pl
from jax.experimental.pallas import tpu as pltpu

_LANES = 128
_DEFAULT_BLOCK_BYTES = 2 * 1024 * 1024  # safe on v5e/v6e default scoped VMEM
_V7X_BLOCK_BYTES = 4 * 1024 * 1024      # larger blocks for 3.2 TB/s HBM on v7x


def _abs_add_kernel(a_ref, o_ref):
    x = a_ref[...]
    o_ref[...] = jnp.abs(x + x)


def _sublanes_for_dtype(dtype) -> int:
    itemsize = jnp.dtype(dtype).itemsize
    return {4: 8, 2: 16, 1: 32}.get(itemsize, 8)


def _device_block_params():
    """Returns (target_block_bytes, is_multi_tensorcore_chip)."""
    kind = ""
    try:
        kind = jax.devices()[0].device_kind.lower()
    except Exception:  # pragma: no cover - defensive, never expected on TPU
        pass
    is_v7 = "7" in kind  # e.g. "tpu7x"
    target = _V7X_BLOCK_BYTES if is_v7 else _DEFAULT_BLOCK_BYTES
    return target, is_v7


def simple_abs_module(a: jax.Array) -> jax.Array:
    """Computes abs(a + a) with the elementwise math inside a Pallas kernel."""
    orig_shape = a.shape
    dtype = a.dtype
    itemsize = jnp.dtype(dtype).itemsize
    sublanes = _sublanes_for_dtype(dtype)

    n = a.size
    flat = a.reshape(-1)

    # Pad only when the lane dimension (128) does not divide the element count.
    # Ragged sublane rows in the last block are handled by the masked partial
    # block of the pl.cdiv grid, so no pad/slice HBM passes are needed for them.
    needs_pad = (n % _LANES) != 0
    if needs_pad:
        padded_n = -(-n // _LANES) * _LANES
        flat = jnp.pad(flat, (0, padded_n - n))
    else:
        padded_n = n

    rows = padded_n // _LANES
    slab = flat.reshape(rows, _LANES)

    target_block_bytes, multi_core = _device_block_params()

    # Row tile: ~target_block_bytes per block, rounded to the dtype's sublane
    # packing, capped at the full slab for small inputs.
    tile_rows = min(rows, max(sublanes, target_block_bytes // (_LANES * itemsize)))
    tile_rows = max(sublanes, (tile_rows // sublanes) * sublanes)

    # On dual-TensorCore chips make sure the parallel grid axis has >= 2 steps
    # so both cores get work (no-op on single-core v5e/v6e).
    if multi_core and rows >= 2 * sublanes:
        half = -(-rows // 2)
        half = max(sublanes, (half // sublanes) * sublanes)
        tile_rows = min(tile_rows, half)

    grid = (pl.cdiv(rows, tile_rows),)

    out = pl.pallas_call(
        _abs_add_kernel,
        out_shape=jax.ShapeDtypeStruct((rows, _LANES), dtype),
        grid=grid,
        in_specs=[pl.BlockSpec((tile_rows, _LANES), lambda i: (i, 0))],
        out_specs=pl.BlockSpec((tile_rows, _LANES), lambda i: (i, 0)),
        input_output_aliases={0: 0},
        compiler_params=pltpu.CompilerParams(
            dimension_semantics=("parallel",)
        ),
    )(slab)

    out_flat = out.reshape(-1)
    if needs_pad:
        out_flat = out_flat[:n]
    return out_flat.reshape(orig_shape)


if __name__ == "__main__":
    key = jax.random.PRNGKey(0)

    # Primary test: small NCHW-shaped input consistent with the PyTorch test.
    x = jax.random.normal(key, (2, 4, 16, 16), dtype=jnp.float32)
    ref = jnp.abs(x + x)
    y = simple_abs_module(x)
    jax.block_until_ready(y)
    assert y.shape == x.shape and y.dtype == x.dtype
    assert jnp.allclose(y, ref), "mismatch vs reference (aligned case)"

    # Relaxed-pad path: element count is a multiple of 128 lanes but NOT of
    # sublanes*128 (15 rows for f32) -> masked partial last block, no pad/slice.
    k1, k2 = jax.random.split(key)
    x2 = jax.random.normal(k1, (5, 3, 128), dtype=jnp.float32)
    y2 = simple_abs_module(x2)
    jax.block_until_ready(y2)
    assert jnp.allclose(y2, jnp.abs(x2 + x2)), "mismatch vs reference (ragged rows)"

    # Pad path: element count not a multiple of 128 lanes.
    x3 = jax.random.normal(k2, (7, 19), dtype=jnp.float32)
    y3 = simple_abs_module(x3)
    jax.block_until_ready(y3)
    assert jnp.allclose(y3, jnp.abs(x3 + x3)), "mismatch vs reference (padded case)"

    print("KERNEL_OK")
</pallas_src>

<mosaic_0001>
module attributes {stable_mosaic.version = 11 : i64} {
  func.func @_abs_add_kernel(%arg0: i32, %arg1: memref<16x128xf32, #tpu.memory_space<vmem>>, %arg2: memref<16x128xf32, #tpu.memory_space<vmem>>) attributes {dimension_semantics = [#tpu.dimension_semantics<parallel>], iteration_bounds = array<i64: 1>, scalar_prefetch = 0 : i64, scratch_operands = 0 : i64, tpu.core_type = #tpu.core_type<tc>, window_params = [{transform_indices = @transform_0, window_bounds = array<i64: 16, 128>}, {transform_indices = @transform_1, window_bounds = array<i64: 16, 128>}]} {
    %c0 = arith.constant 0 : index
    %c0_0 = arith.constant 0 : index
    %0 = vector.load %arg1[%c0, %c0_0] : memref<16x128xf32, #tpu.memory_space<vmem>>, vector<16x128xf32>
    %1 = arith.addf %0, %0 : vector<16x128xf32>
    %2 = math.absf %1 : vector<16x128xf32>
    %c0_1 = arith.constant 0 : index
    %c0_2 = arith.constant 0 : index
    %3 = vector.load %arg2[%c0_1, %c0_2] : memref<16x128xf32, #tpu.memory_space<vmem>>, vector<16x128xf32>
    tpu.vector_store %arg2[%c0_1, %c0_2], %2 {strides = array<i32>} : memref<16x128xf32, #tpu.memory_space<vmem>>, vector<16x128xf32>,
    return
  }
  func.func @transform_0(%arg0: i32) -> (i32, i32) {
    %c0_i32 = arith.constant 0 : i32
    %c0_i32_0 = arith.constant 0 : i32
    return %arg0, %c0_i32 : i32, i32
  }
  func.func @transform_1(%arg0: i32) -> (i32, i32) {
    %c0_i32 = arith.constant 0 : i32
    %c0_i32_0 = arith.constant 0 : i32
    return %arg0, %c0_i32 : i32, i32
  }
}

</mosaic_0001>

<bundles_post_ra>
// kernel: tpu_custom_call.1
= control target key start
LH: loop header
LB: loop body
LE: loop exit
PB: predicated region body
PF: predicated region fallthrough
CT: control target
= control target key end

     0   :  { %6 = vsyncpa [#allocation3], 0  ;;  %s144_s0 = inlined_call_operand.hbm [shape: f32[16,128], index: 0, kind: input, shape index: {}, may-alias: {0,1}]   ;;  %s145_s1 = inlined_call_operand.hbm [shape: f32[16,128], index: 1, kind: output, shape index: {}, may-alias: {0,1}]  }
   0x1   :  { %7 = vsyncpa [#allocation4], 0  ;;  %s100_s6 = smov [#allocation2]   ;;  %s52_s10 = scalar_lea.hbm %s144_s0, 256 }
   0x2   :  { %s13_s7 = sshll.u32 %s100_s6, 4  ;;  %p53_p0 = scmp.ne.s32.totalorder %s144_s0, %s52_s10  ;;  %s14_s7 = int_to_ptr.vmem [resolvable:$true] %s13_s7 }
   0x3   :  { %p56_p1 = scmp.lt.u32.totalorder %s52_s10, %s144_s0 }
   0x5   :  { %p58_p2 = pnand %p56_p1, %p53_p0 }
   0x7   :  { %61 = shalt.err (!%p58_p2)
}
   0x8   :  { %s62_s15 = scalar_lea.vmem %s14_s7, 256  ;;  %p67_p4 = scmp.lt.s32.totalorder %s14_s7, %s14_s7 }
   0x9   :  { %p63_p3 = scmp.ne.s32.totalorder %s14_s7, %s62_s15  ;;  %p68_p5 = scmp.lt.s32.totalorder %s62_s15, %s62_s15 }
   0xb   :  { %p69_p6 = por %p68_p5, %p67_p4 }
   0xd   :  { %p70_p7 = pnand %p69_p6, %p63_p3 }
   0xf   :  { %73 = shalt.err (!%p70_p7)
}
  0x10   :  { %s101_s16 = smov 128   ;;  %s102_s17 = smov 8  }
  0x11   :  { %19 = dma.hbm_to_vmem [thread:$0]  %s144_s0, 256, %s14_s7, [#allocation3], %s101_s16, %s101_s16, %s102_s17  }
  0x12   :  { %96 = dma.done.wait [#allocation3], 256  }
  0x13   :  { %97 = vsyncadd [#allocation3], 4294967040  ;;  %v23_v0 = vld [vmem:[#allocation2] sm:$0xff]  ;;  %v24_v1 = vld [vmem:[#allocation2 + $0x8] sm:$0xff]  ;;  %s103_s20 = smov [#allocation5]  }
  0x14   :  { %s36_s21 = sshll.u32 %s103_s20, 4  ;;  %v25_v2 = vadd.f32 %v23_v0, %v23_v0  ;;  %v26_v3 = vadd.f32 %v24_v1, %v24_v1  ;;  %s37_s21 = int_to_ptr.vmem [resolvable:$true] %s36_s21 }
  0x15   :  { %s74_s22 = scalar_lea.vmem %s37_s21, 256  ;;  %p79_p9 = scmp.lt.s32.totalorder %s37_s21, %s37_s21 }
  0x16   :  { %v27_v4 = vand.u32 2147483647, %v25_v2  ;;  %v28_v5 = vand.u32 2147483647, %v26_v3  ;;  %p75_p8 = scmp.ne.s32.totalorder %s37_s21, %s74_s22  ;;  %p80_p10 = scmp.lt.s32.totalorder %s74_s22, %s74_s22 }
  0x18   :  { %29 = vst [vmem:[#allocation5] sm:$0xff] %v27_v4  ;;  %30 = vst [vmem:[#allocation5 + $0x8] sm:$0xff] %v28_v5  ;;  %p81_p11 = por %p80_p10, %p79_p9 }
  0x1a   :  { %p82_p12 = pnand %p81_p11, %p75_p8 }
  0x1c   :  { %85 = shalt.err (!%p82_p12)
}
  0x1d   :  { %s86_s24 = scalar_lea.hbm %s145_s1, 256 }
  0x1e   :  { %p87_p13 = scmp.ne.s32.totalorder %s145_s1, %s86_s24  ;;  %p90_p0 = scmp.lt.u32.totalorder %s86_s24, %s145_s1 }
  0x20   :  { %p92_p1 = pnand %p90_p0, %p87_p13 }
  0x22   :  { %95 = shalt.err (!%p92_p1)
}
  0x23   :  { %42 = dma.vmem_to_hbm [thread:$0]  %s37_s21, 256, %s145_s1, [#allocation4], %s101_s16, %s101_s16, %s102_s17  }
  0x24   :  { %98 = dma.done.wait [#allocation4], 256  }
  0x25   :  { %99 = vsyncadd [#allocation4], 4294967040 }
  0x26   :  { %46 = vsyncpa [#allocation3], 1 }
  0x27   :  { %47 = vsyncpa [#allocation4], 1 }

</bundles_post_ra>
